<compile_context>
chip_gen: v5e
topology: v5e:2x2
jax: 0.10.0
libtpu: 0.0.40
codegen_flags: <defaults>
</compile_context>

<pallas_src>
import functools
import math

import jax
import jax.numpy as jnp
from jax.experimental import pallas as pl
from jax.experimental.pallas import tpu as pltpu


def _round_up(x, m):
    return ((x + m - 1) // m) * m


def _vmem_capacity_bytes():
    """Per-core VMEM capacity; conservative fallback if the query fails."""
    try:
        return int(pltpu.get_tpu_info().vmem_capacity_bytes)
    except Exception:
        return 64 * 1024 * 1024   # v7x per-TC VMEM (the smallest generation)


def _spectrum_kernel(b_ref, w_ref, o_ref, *, eps, relative_floor, out_format,
                     compute_dtype):
    # Input streamed in its native dtype; cast in VMEM (cheap VPU cast).
    b = b_ref[...].astype(compute_dtype)
    # Two fused MXU matmuls against the stacked [cos; sin] real-DFT basis.
    # Accumulation is always f32 (preferred_element_type), compute dtype may
    # be bf16 (default, 2-4x MXU throughput) or f32 (high-precision mode).
    re = jnp.dot(b, w_ref[0], preferred_element_type=jnp.float32)
    im = jnp.dot(b, w_ref[1], preferred_element_type=jnp.float32)
    s = re * re + im * im
    if eps:
        s = s + eps
    if relative_floor is not None:
        m = jnp.max(s, axis=-1, keepdims=True)       # XLU row reduction
        s = jnp.maximum(s, m * relative_floor)
    if out_format == "db":
        s = 10.0 * jnp.log10(s)                       # EUP
    elif out_format == "log-magnitude":
        s = 0.5 * jnp.log(s)                          # EUP
    elif out_format == "magnitude":
        s = jnp.sqrt(s)                               # EUP
    elif out_format == "power":
        pass
    else:
        raise ValueError(f"out_format {out_format} is not supported.")
    o_ref[...] = s.astype(o_ref.dtype)


def _vmem_estimate(tile_n, m_rows, basis_cols, tile_k_out,
                   in_itemsize, basis_itemsize, out_itemsize, basis_buffers):
    return (
        2 * tile_n * m_rows * in_itemsize                       # input, dbl-buffered
        + 2 * tile_n * tile_k_out * out_itemsize                # output, dbl-buffered
        + basis_buffers * 2 * m_rows * basis_cols * basis_itemsize   # [cos;sin] basis
        + tile_n * m_rows * 4                                   # casted input copy
        + 4 * tile_n * tile_k_out * 4                           # f32 intermediates
    )


class Spectrum:
    """JAX/Pallas port of diffsptk Spectrum (numerator-only path)."""

    _VALID_FORMATS = ("db", "log-magnitude", "magnitude", "power")

    def __init__(self, fft_length, *, eps=0.0, relative_floor=None,
                 out_format="power", precision="bfloat16",
                 out_dtype=jnp.float32, max_resident_basis_bytes=None):
        assert 2 <= fft_length
        assert 0 <= eps
        assert relative_floor is None or relative_floor < 0
        if out_format not in self._VALID_FORMATS:
            raise ValueError(f"out_format {out_format} is not supported.")
        if precision not in ("bfloat16", "float32"):
            raise ValueError(f"precision {precision} is not supported.")
        self.fft_length = int(fft_length)
        self.eps = float(eps)
        self.relative_floor = (
            None if relative_floor is None else 10.0 ** (relative_floor / 10.0)
        )
        self.out_format = out_format
        self.compute_dtype = jnp.bfloat16 if precision == "bfloat16" else jnp.float32
        self.out_dtype = jnp.dtype(out_dtype)
        self._max_resident_basis_bytes = max_resident_basis_bytes
        self._basis_cache = {}   # (m_rows, K, k_cols, dtype) -> (2, M+1, k_cols)

    # ------------------------------------------------------------------ basis
    def _basis(self, m_rows, K, k_cols):
        key = (m_rows, K, k_cols, jnp.dtype(self.compute_dtype).name)
        w = self._basis_cache.get(key)
        if w is None:
            L = self.fft_length
            m = jnp.arange(m_rows, dtype=jnp.float32)[:, None]    # (M+1, 1)
            k = jnp.arange(K, dtype=jnp.float32)[None, :]         # (1, K)
            ang = (2.0 * math.pi / float(L)) * m * k
            # rfft(b)[k] = sum_m b[m] exp(-j 2 pi m k / L); the sin sign is
            # irrelevant because only |.|^2 is used.
            w = jnp.stack([jnp.cos(ang), jnp.sin(ang)])            # (2, M+1, K)
            if k_cols > K:                                         # zero pad cols
                w = jnp.pad(w, ((0, 0), (0, 0), (0, k_cols - K)))
            w = w.astype(self.compute_dtype)
            self._basis_cache[key] = w
        return w

    # ---------------------------------------------------------------- forward
    def __call__(self, b=None, a=None):
        if b is None and a is None:
            raise ValueError("Either b or a must be specified.")
        if a is not None:
            # TODO(synk): denominator path (remove_gain, K/A, K*B/A) not kernelized.
            raise NotImplementedError("only the numerator (a=None) path is kernelized")

        L = self.fft_length
        K = L // 2 + 1
        orig_shape = b.shape
        m_rows = orig_shape[-1]
        if m_rows > L:
            b = b[..., :L]          # rfft(b, n=L) truncation semantics
            m_rows = L

        b2d = jnp.reshape(b, (-1, m_rows))
        N = b2d.shape[0]
        in_itemsize = jnp.dtype(b2d.dtype).itemsize
        basis_itemsize = jnp.dtype(self.compute_dtype).itemsize
        out_itemsize = self.out_dtype.itemsize

        vmem_cap = _vmem_capacity_bytes()
        budget = int(0.45 * vmem_cap)
        max_resident = (self._max_resident_basis_bytes
                        if self._max_resident_basis_bytes is not None
                        else vmem_cap // 4)

        resident_basis_bytes = 2 * m_rows * K * basis_itemsize
        # Large-L fallback: stream the basis per 128-column block along a second
        # grid axis. relative_floor needs the full row, so it keeps the resident path.
        column_tiling = (self.relative_floor is None
                         and resident_basis_bytes > max_resident)

        if column_tiling:
            tile_k = 128
            k_cols = _round_up(K, tile_k)
            n_col_tiles = k_cols // tile_k
            out_tile_k = tile_k
            basis_buffers = 2          # streamed, double-buffered
            basis_block_cols = tile_k
        else:
            tile_k = K
            k_cols = K
            n_col_tiles = 1
            out_tile_k = K
            basis_buffers = 1          # single resident VMEM copy
            basis_block_cols = K

        w = self._basis(m_rows, K, k_cols)

        # Generation-aware row tile: start big on 128-MiB chips, halve to fit.
        tile_n = 2048 if vmem_cap >= (100 << 20) else 1024
        tile_n = min(tile_n, _round_up(N, 8))
        while tile_n > 8 and _vmem_estimate(
                tile_n, m_rows, basis_block_cols, out_tile_k,
                in_itemsize, basis_itemsize, out_itemsize, basis_buffers) > budget:
            tile_n = max(8, _round_up(tile_n // 2, 8))
        # Give v7x's two TensorCores at least two parallel grid steps.
        while tile_n > 8 and ((N + tile_n - 1) // tile_n) * n_col_tiles < 2:
            tile_n = max(8, _round_up(tile_n // 2, 8))

        n_row_tiles = (N + tile_n - 1) // tile_n
        grid = (n_row_tiles, n_col_tiles)

        est = _vmem_estimate(tile_n, m_rows, basis_block_cols, out_tile_k,
                             in_itemsize, basis_itemsize, out_itemsize,
                             basis_buffers)
        # Keep ~25% of per-core VMEM as head-room for Mosaic internal scratch.
        vmem_limit = int(min(int(0.75 * vmem_cap), max(2 * est, 32 << 20)))

        if column_tiling:
            basis_spec = pl.BlockSpec((2, m_rows, tile_k), lambda i, j: (0, 0, j))
        else:
            # Constant-index resident operand: whole basis placed once in VMEM,
            # no double-buffering (halves resident-basis VMEM vs default).
            basis_spec = pl.BlockSpec(memory_space=pltpu.MemorySpace.VMEM)

        transc = N * K if self.out_format != "power" else 0
        cost = pl.CostEstimate(
            flops=4 * N * m_rows * K + 5 * N * K,
            transcendentals=transc,
            bytes_accessed=(N * m_rows * in_itemsize
                            + N * K * out_itemsize
                            + 2 * m_rows * k_cols * basis_itemsize
                            * (n_row_tiles if column_tiling else 1)),
        )

        kernel = functools.partial(
            _spectrum_kernel,
            eps=self.eps,
            relative_floor=self.relative_floor,
            out_format=self.out_format,
            compute_dtype=self.compute_dtype,
        )

        out = pl.pallas_call(
            kernel,
            out_shape=jax.ShapeDtypeStruct((N, K), self.out_dtype),
            grid=grid,
            in_specs=[
                pl.BlockSpec((tile_n, m_rows), lambda i, j: (i, 0)),
                basis_spec,
            ],
            out_specs=pl.BlockSpec((tile_n, out_tile_k), lambda i, j: (i, j)),
            compiler_params=pltpu.CompilerParams(
                dimension_semantics=("parallel", "parallel"),
                vmem_limit_bytes=vmem_limit,
            ),
            cost_estimate=cost,
        )(b2d, w)

        return jnp.reshape(out, orig_shape[:-1] + (K,))


if __name__ == "__main__":
    key = jax.random.PRNGKey(0)
    k1, k2, k3 = jax.random.split(key, 3)

    # --- 1) small case: default bf16 MXU path, power format -----------------
    batch, chan, m_plus_1 = 2, 4, 8
    L1 = 16
    b1 = jax.random.normal(k1, (batch, chan, m_plus_1), dtype=jnp.float32)
    ref1 = jnp.abs(jnp.fft.rfft(b1, n=L1, axis=-1)) ** 2

    spec_bf16 = Spectrum(L1, eps=0.0, out_format="power")          # bf16 default
    y1 = jax.block_until_ready(spec_bf16(b1))
    assert y1.shape == (batch, chan, L1 // 2 + 1)
    assert jnp.allclose(y1, ref1, rtol=3e-2, atol=3e-2 * float(jnp.max(ref1)))

    # same data, opt-in float32 precision -> tight tolerance
    spec_f32 = Spectrum(L1, eps=0.0, out_format="power", precision="float32")
    y1f = jax.block_until_ready(spec_f32(b1))
    assert jnp.allclose(y1f, ref1, rtol=1e-4, atol=1e-4)

    # --- 2) multi row-tile: relative floor + magnitude format (f32) ---------
    b2 = jax.random.normal(k2, (3, 200, 12), dtype=jnp.float32)
    L2, eps2, rf_db = 32, 1e-8, -80.0
    spec2 = Spectrum(L2, eps=eps2, relative_floor=rf_db, out_format="magnitude",
                     precision="float32")
    y2 = jax.block_until_ready(spec2(b2))
    p = jnp.abs(jnp.fft.rfft(b2, n=L2, axis=-1)) ** 2 + eps2
    mrow = jnp.max(p, axis=-1, keepdims=True)
    ref2 = jnp.sqrt(jnp.maximum(p, mrow * (10.0 ** (rf_db / 10.0))))
    assert y2.shape == (3, 200, L2 // 2 + 1)
    assert jnp.allclose(y2, ref2, rtol=1e-4, atol=1e-4)

    # --- 3) forced column-tiled (large-L fallback) path ----------------------
    b3 = jax.random.normal(k3, (2, 40, 64), dtype=jnp.float32)
    L3 = 256
    spec3 = Spectrum(L3, eps=0.0, out_format="power", precision="float32",
                     max_resident_basis_bytes=1)    # force K-axis streaming
    y3 = jax.block_until_ready(spec3(b3))
    ref3 = jnp.abs(jnp.fft.rfft(b3, n=L3, axis=-1)) ** 2
    assert y3.shape == (2, 40, L3 // 2 + 1)
    assert jnp.allclose(y3, ref3, rtol=1e-4, atol=1e-3)

    print("KERNEL_OK")
</pallas_src>

<mosaic_0001>
module attributes {stable_mosaic.version = 11 : i64} {
  func.func @_spectrum_kernel(%arg0: i32, %arg1: i32, %arg2: memref<8x8xf32, #tpu.memory_space<vmem>>, %arg3: memref<2x8x9xbf16, #tpu.memory_space<vmem>>, %arg4: memref<8x9xf32, #tpu.memory_space<vmem>>) attributes {dimension_semantics = [#tpu.dimension_semantics<parallel>, #tpu.dimension_semantics<parallel>], iteration_bounds = array<i64: 1, 1>, scalar_prefetch = 0 : i64, scratch_operands = 0 : i64, tpu.core_type = #tpu.core_type<tc>, window_params = [{transform_indices = @transform_0, window_bounds = array<i64: 8, 8>}, {pipeline_mode = #tpu.pipeline_mode<synchronous>, transform_indices = @transform_1, window_bounds = array<i64: 2, 8, 9>}, {transform_indices = @transform_2, window_bounds = array<i64: 8, 9>}]} {
    %c0 = arith.constant 0 : index
    %c0_0 = arith.constant 0 : index
    %0 = vector.load %arg2[%c0, %c0_0] : memref<8x8xf32, #tpu.memory_space<vmem>>, vector<8x8xf32>
    %1 = arith.truncf %0 : vector<8x8xf32> to vector<8x8xbf16>
    %c0_1 = arith.constant 0 : index
    %c0_2 = arith.constant 0 : index
    %c0_3 = arith.constant 0 : index
    %2 = vector.load %arg3[%c0_1, %c0_2, %c0_3] : memref<2x8x9xbf16, #tpu.memory_space<vmem>>, vector<1x8x9xbf16>
    %3 = vector.shape_cast %2 : vector<1x8x9xbf16> to vector<8x9xbf16>
    %cst = arith.constant dense<0.000000e+00> : vector<8x9xf32>
    %4 = tpu.matmul %1, %3, %cst {dimension_numbers = #tpu.dot_dimension_numbers<[1], [0], [0], [1], [0, 0, 1, 1], [], []>} : vector<8x8xbf16>, vector<8x9xbf16>, vector<8x9xf32> -> vector<8x9xf32>
    %c1 = arith.constant 1 : index
    %c0_4 = arith.constant 0 : index
    %c0_5 = arith.constant 0 : index
    %5 = vector.load %arg3[%c1, %c0_4, %c0_5] : memref<2x8x9xbf16, #tpu.memory_space<vmem>>, vector<1x8x9xbf16>
    %6 = vector.shape_cast %5 : vector<1x8x9xbf16> to vector<8x9xbf16>
    %cst_6 = arith.constant dense<0.000000e+00> : vector<8x9xf32>
    %7 = tpu.matmul %1, %6, %cst_6 {dimension_numbers = #tpu.dot_dimension_numbers<[1], [0], [0], [1], [0, 0, 1, 1], [], []>} : vector<8x8xbf16>, vector<8x9xbf16>, vector<8x9xf32> -> vector<8x9xf32>
    %8 = arith.mulf %4, %4 : vector<8x9xf32>
    %9 = arith.mulf %7, %7 : vector<8x9xf32>
    %10 = arith.addf %8, %9 : vector<8x9xf32>
    %c0_7 = arith.constant 0 : index
    %c0_8 = arith.constant 0 : index
    %11 = vector.load %arg4[%c0_7, %c0_8] : memref<8x9xf32, #tpu.memory_space<vmem>>, vector<8x9xf32>
    tpu.vector_store %arg4[%c0_7, %c0_8], %10 {strides = array<i32>} : memref<8x9xf32, #tpu.memory_space<vmem>>, vector<8x9xf32>,
    return
  }
  func.func @transform_0(%arg0: i32, %arg1: i32) -> (i32, i32) {
    %c0_i32 = arith.constant 0 : i32
    %c0_i32_0 = arith.constant 0 : i32
    return %arg0, %c0_i32 : i32, i32
  }
  func.func @transform_1(%arg0: i32, %arg1: i32) -> (i32, i32, i32) {
    %c0_i32 = arith.constant 0 : i32
    %c0_i32_0 = arith.constant 0 : i32
    %c0_i32_1 = arith.constant 0 : i32
    %c0_i32_2 = arith.constant 0 : i32
    return %c0_i32, %c0_i32_0, %c0_i32_1 : i32, i32, i32
  }
  func.func @transform_2(%arg0: i32, %arg1: i32) -> (i32, i32) {
    %c0_i32 = arith.constant 0 : i32
    return %arg0, %arg1 : i32, i32
  }
}

</mosaic_0001>

<bundles_post_ra>
// kernel: tpu_custom_call.1
= control target key start
LH: loop header
LB: loop body
LE: loop exit
PB: predicated region body
PF: predicated region fallthrough
CT: control target
= control target key end

     0   :  { %7 = vsyncpa [#allocation3], 0  ;;  %s222_s0 = inlined_call_operand.hbm [shape: f32[8,8], index: 0, kind: input, shape index: {}]   ;;  %s223_s1 = inlined_call_operand.hbm [shape: bf16[2,8,9], index: 1, kind: input, shape index: {}]   ;;  %s224_s2 = inlined_call_operand.hbm [shape: f32[8,9], index: 2, kind: output, shape index: {}]  }
   0x1   :  { %8 = vsyncpa [#allocation6], 0 }
   0x2   :  { %9 = vsyncpa [#allocation4], 0  ;;  %s15_s11 = sshll.u32 %s222_s0, 4  ;;  %s193_s12 = smov [#allocation2]   ;;  %s16_s11 = int_to_ptr.hbm [resolvable:$true] %s15_s11 }
   0x3   :  { %s17_s13 = sshll.u32 %s193_s12, 4  ;;  %s25_s16 = sshll.u32 %s223_s1, 4  ;;  %s18_s13 = int_to_ptr.vmem [resolvable:$true] %s17_s13  ;;  %s26_s16 = int_to_ptr.hbm [resolvable:$true] %s25_s16 }
   0x4   :  { %20 = dma.hbm_to_vmem [thread:$0]  %s16_s11, 128, %s18_s13, [#allocation3]  }
   0x5   :  { %s194_s17 = smov [#allocation5]   ;;  %s195_s19 = smov 64  }
   0x6   :  { %s27_s18 = sshll.u32 %s194_s17, 4  ;;  %s196_s20 = smov 4   ;;  %s28_s18 = int_to_ptr.vmem [resolvable:$true] %s27_s18 }
   0x7   :  { %33 = dma.hbm_to_vmem [thread:$0]  %s26_s16, 128, %s28_s18, [#allocation6], %s195_s19, %s195_s19, %s196_s20  }
   0x8   :  { %187 = dma.done.wait [#allocation3], 128  }
   0x9   :  { %188 = vsyncadd [#allocation3], 4294967168 }
   0xa   :  { %189 = dma.done.wait [#allocation6], 128  }
   0xb   :  { %190 = vsyncadd [#allocation6], 4294967168  ;;  %vm50_vm0 = vcmask 1043456   ;;  %v45_v0 = vld [vmem:[#allocation5] sm:$0xf]  ;;  %v43_v2 = vld [vmem:[#allocation2] sm:$0xff] }
   0xc   :  { %v68_v1 = vld [vmem:[#allocation5 + $0x4] sm:$0xf]  ;;  %v52_v3 = vsel %vm50_vm0, %v45_v0, 0  ;;  %v44_v5 = vpack.c.bf16 %v43_v2, %v43_v2  ;;  %vm46_vm1 = vcmask 64512   ;;  %s197_s0 = smov [#allocation7]   ;;  %s97_s23 = sshll.u32 %s224_s2, 4  ;;  %s98_s23 = int_to_ptr.hbm [resolvable:$true] %s97_s23 }
   0xd   :  { %v70_v4 = vsel %vm50_vm0, %v68_v1, 0  ;;  %61 = vmatpush.bf16.msra.mxu0 %v52_v3  ;;  %s95_s1 = sshll.u32 %s197_s0, 4  ;;  %vm88_vm2 = vcmask 72704   ;;  %s96_s1 = int_to_ptr.vmem [resolvable:$true] %s95_s1 }
   0xe   :  { %79 = vmatpush.bf16.msra.mxu1 %v70_v4 }
  0x10   :  { %108 = vmatmul.msk.bf16.vlgmr.msra.gmra.mxu0 %vm46_vm1, %v44_v5 }
  0x11   :  { %109 = vmatmul.msk.bf16.vlgmr.msra.gmra.mxu1 %vm46_vm1, %v44_v5 }
  0x8d   :  { %v63_v6 = vpop.f32.mrf.mxu0 }
  0x8e   :  { %v81_v7 = vpop.f32.mrf.mxu1  ;;  %v85_v8 = vmul.f32 %v63_v6, %v63_v6 }
  0x8f   :  { %v86_v9 = vmul.f32 %v81_v7, %v81_v7 }
  0x91   :  { %v87_v10 = vadd.f32 %v86_v9, %v85_v8 }
  0x93   :  { %89 = vst.msk [vmem:[#allocation7] sm:$0xff] %vm88_vm2, %v87_v10 }
  0x94   :  { %100 = dma.vmem_to_hbm [thread:$0]  %s96_s1, 128, %s98_s23, [#allocation4]  }
  0x95   :  { %v65_v11 = vpop.f32.mrf.mxu0 }
  0x96   :  { %v83_v12 = vpop.f32.mrf.mxu1 }
  0x97   :  { %191 = dma.done.wait [#allocation4], 128  }
  0x98   :  { %192 = vsyncadd [#allocation4], 4294967168 }
  0x99   :  { %105 = vsyncpa [#allocation3], 1 }
  0x9a   :  { %106 = vsyncpa [#allocation6], 1 }
  0x9b   :  { %107 = vsyncpa [#allocation4], 1 }

</bundles_post_ra>
